<compile_context>
chip_gen: v5e
topology: v5e:2x2
jax: 0.10.0
libtpu: 0.0.40
codegen_flags: <defaults>
</compile_context>

<pallas_src>
import jax
import jax.numpy as jnp
from jax.experimental import pallas as pl
from jax.experimental.pallas import tpu as pltpu


# Conservative scratch budget that is safe on v5e/v6e (128 MiB physical) and
# v7x (64 MiB physical), leaving headroom for compiler internals.
_VMEM_BUDGET = 40 * 1024 * 1024


def _vmem_limit(block_bytes):
    """Explicit scoped-VMEM limit: cover the double-buffered blocks + margin."""
    return int(min(max(block_bytes + (8 << 20), 32 << 20), 64 << 20))


def _choose_hw_tile(C, HW, itemsize):
    """Largest lane-dense (multiple of 128) HW tile whose double-buffered
    input + output blocks fit comfortably in the VMEM budget."""
    if HW % 128 != 0:
        # TODO(synk): for late VoVNet stages (HW < 128, C % 128 == 0) a
        # channels-last (HW, C) layout would give lane-dense stores; that needs
        # NHWC plumbing from the surrounding graph, so we keep (C, HW) here.
        return HW
    per_lane_bytes = 4 * C * itemsize            # 2x in + 2x out buffers / lane
    t = (_VMEM_BUDGET // 2 // per_lane_bytes) // 128 * 128
    t = max(128, min(t, HW, 8 * 1024))
    while HW % t != 0 and t > 128:
        t -= 128
    return t if HW % t == 0 else HW


# --------------------------------------------------------------------------
# Fused single-pass kernel: one grid step per batch element.
# --------------------------------------------------------------------------
def _ese_fused_kernel(x_ref, w_ref, b_ref, o_ref):
    # x_ref: (1, C, HW)  w_ref: (C, C) = W/(6*HW)  b_ref: (C, 1) = (b+3)/6
    x = x_ref[0]                                                   # (C, HW), input dtype
    # f32 accumulate for the pool without materializing an f32 copy of x.
    pooled = jnp.sum(x, axis=-1, keepdims=True, dtype=jnp.float32)  # (C, 1)
    y = jnp.dot(w_ref[...], pooled,
                preferred_element_type=jnp.float32) + b_ref[...]    # (C, 1)
    scale = jnp.clip(y, 0.0, 1.0)                                   # hsigmoid (folded)
    # Broadcast multiply in the input dtype (native bf16 VALU on v6e/v7x).
    o_ref[0] = x * scale.astype(x_ref.dtype)


# --------------------------------------------------------------------------
# Two-pass kernels.
# --------------------------------------------------------------------------
def _pool_fc_kernel(x_ref, w_ref, b_ref, scale_ref):
    # grid = (N, HW//T); HW axis is the ("arbitrary") reduction axis.
    # x_ref: (1, C, T)  w_ref: (C, C)  b_ref: (C, 1)  scale_ref: (1, C, 1) f32
    hw = pl.program_id(1)

    @pl.when(hw == 0)
    def _():
        scale_ref[...] = jnp.zeros_like(scale_ref)

    scale_ref[0] += jnp.sum(x_ref[0], axis=-1, keepdims=True, dtype=jnp.float32)

    @pl.when(hw == pl.num_programs(1) - 1)
    def _():
        # Tiny (C,C)@(C,1) matvec, once per batch element, off the hot path.
        y = jnp.dot(w_ref[...], scale_ref[0],
                    preferred_element_type=jnp.float32) + b_ref[...]
        scale_ref[0] = jnp.clip(y, 0.0, 1.0)


def _scale_mul_kernel(x_ref, scale_ref, o_ref):
    # x_ref: (1, C, T)  scale_ref: (1, C, 1) f32  o_ref: (1, C, T)
    o_ref[0] = x_ref[0] * scale_ref[0].astype(x_ref.dtype)


# --------------------------------------------------------------------------
# Wrapper.
# --------------------------------------------------------------------------
def ese_module(x, weight, bias, *, force_two_pass=False):
    """x: (N, C, H, W), weight: (C, C), bias: (C,) -> (N, C, H, W)."""
    N, C, H, W = x.shape
    HW = H * W
    itemsize = x.dtype.itemsize
    x_flat = x.reshape(N, C, HW)

    # Fold 1/HW (mean) and the hsigmoid constants into the parameters.
    w_prep = weight.astype(jnp.float32) * (1.0 / (6.0 * HW))        # (C, C)
    b_prep = ((bias.astype(jnp.float32) + 3.0) / 6.0).reshape(C, 1)  # (C, 1)

    weight_bytes = C * C * 4
    fused_block_bytes = 4 * C * HW * itemsize        # dbl-buffered in + out per batch
    use_fused = (not force_two_pass) and (fused_block_bytes + weight_bytes <= _VMEM_BUDGET)

    if use_fused:
        out = pl.pallas_call(
            _ese_fused_kernel,
            out_shape=jax.ShapeDtypeStruct((N, C, HW), x.dtype),
            grid_spec=pltpu.PrefetchScalarGridSpec(
                num_scalar_prefetch=0,
                grid=(N,),
                in_specs=[
                    pl.BlockSpec((1, C, HW), lambda n: (n, 0, 0)),   # per-batch image
                    pl.BlockSpec((C, C), lambda n: (0, 0)),          # folded fc weight
                    pl.BlockSpec((C, 1), lambda n: (0, 0)),          # folded fc bias
                ],
                out_specs=pl.BlockSpec((1, C, HW), lambda n: (n, 0, 0)),
            ),
            compiler_params=pltpu.CompilerParams(
                dimension_semantics=("parallel",),
                vmem_limit_bytes=_vmem_limit(fused_block_bytes + weight_bytes)),
            cost_estimate=pl.CostEstimate(
                flops=2 * N * C * HW + 2 * N * C * C,
                transcendentals=0,
                bytes_accessed=2 * N * C * HW * itemsize + weight_bytes + C * 4),
        )(x_flat, w_prep, b_prep)
        return out.reshape(N, C, H, W)

    # ---------------- Two-pass path (large maps / small VMEM) ----------------
    T = _choose_hw_tile(C, HW, itemsize)
    n_hw = HW // T

    # Pass 1: pooled sum -> FC -> hsigmoid  =>  scale (N, C, 1) in f32.
    pool_block_bytes = 2 * C * T * itemsize + weight_bytes + 4 * C * 4
    scale = pl.pallas_call(
        _pool_fc_kernel,
        out_shape=jax.ShapeDtypeStruct((N, C, 1), jnp.float32),
        grid_spec=pltpu.PrefetchScalarGridSpec(
            num_scalar_prefetch=0,
            grid=(N, n_hw),
            in_specs=[
                pl.BlockSpec((1, C, T), lambda n, h: (n, 0, h)),
                pl.BlockSpec((C, C), lambda n, h: (0, 0)),
                pl.BlockSpec((C, 1), lambda n, h: (0, 0)),
            ],
            out_specs=pl.BlockSpec((1, C, 1), lambda n, h: (n, 0, 0)),
        ),
        compiler_params=pltpu.CompilerParams(
            dimension_semantics=("parallel", "arbitrary"),
            vmem_limit_bytes=_vmem_limit(pool_block_bytes)),
        cost_estimate=pl.CostEstimate(
            flops=N * C * HW + 2 * N * C * C,
            transcendentals=0,
            bytes_accessed=N * C * HW * itemsize + weight_bytes + N * C * 4),
    )(x_flat, w_prep, b_prep)

    # Pass 2: lane-dense broadcast multiply, fully parallel (N, HW//T) grid.
    mul_block_bytes = 4 * C * T * itemsize + 2 * C * 4
    out = pl.pallas_call(
        _scale_mul_kernel,
        out_shape=jax.ShapeDtypeStruct((N, C, HW), x.dtype),
        grid_spec=pltpu.PrefetchScalarGridSpec(
            num_scalar_prefetch=0,
            grid=(N, n_hw),
            in_specs=[
                pl.BlockSpec((1, C, T), lambda n, h: (n, 0, h)),
                pl.BlockSpec((1, C, 1), lambda n, h: (n, 0, 0)),
            ],
            out_specs=pl.BlockSpec((1, C, T), lambda n, h: (n, 0, h)),
        ),
        compiler_params=pltpu.CompilerParams(
            dimension_semantics=("parallel", "parallel"),
            vmem_limit_bytes=_vmem_limit(mul_block_bytes)),
        cost_estimate=pl.CostEstimate(
            flops=N * C * HW,
            transcendentals=0,
            bytes_accessed=2 * N * C * HW * itemsize + N * C * 4),
    )(x_flat, scale)
    return out.reshape(N, C, H, W)


def _ese_reference(x, weight, bias):
    pooled = jnp.mean(x, axis=(2, 3), keepdims=True)                    # (N, C, 1, 1)
    y = jnp.einsum("oc,ncab->noab", weight, pooled) + bias[None, :, None, None]
    scale = jnp.clip(y + 3.0, 0.0, 6.0) / 6.0                           # hsigmoid
    return x * scale


if __name__ == "__main__":
    key = jax.random.PRNGKey(0)
    k_x, k_w, k_b = jax.random.split(key, 3)

    N, C, H, W = 2, 4, 16, 16
    x = jax.random.normal(k_x, (N, C, H, W), dtype=jnp.float32)
    # Deterministic synthetic parameters for the 1x1 conv (Conv2d(C, C, 1)).
    weight = jax.random.normal(k_w, (C, C), dtype=jnp.float32) * 0.1
    bias = jax.random.normal(k_b, (C,), dtype=jnp.float32) * 0.1

    ref = _ese_reference(x, weight, bias)

    out_fused = ese_module(x, weight, bias)                        # fused single-pass path
    out_split = ese_module(x, weight, bias, force_two_pass=True)   # two-pass path
    jax.block_until_ready((out_fused, out_split))

    assert out_fused.shape == (N, C, H, W)
    assert jnp.allclose(out_fused, ref, atol=1e-5, rtol=1e-5), "fused path mismatch"
    assert jnp.allclose(out_split, ref, atol=1e-5, rtol=1e-5), "two-pass path mismatch"

    print("KERNEL_OK")
</pallas_src>

<mosaic_0001>
module attributes {stable_mosaic.version = 11 : i64} {
  func.func @_ese_fused_kernel(%arg0: i32, %arg1: memref<1x4x256xf32, #tpu.memory_space<vmem>>, %arg2: memref<4x4xf32, #tpu.memory_space<vmem>>, %arg3: memref<4x1xf32, #tpu.memory_space<vmem>>, %arg4: memref<1x4x256xf32, #tpu.memory_space<vmem>>) attributes {dimension_semantics = [#tpu.dimension_semantics<parallel>], iteration_bounds = array<i64: 2>, scalar_prefetch = 0 : i64, scratch_operands = 0 : i64, tpu.core_type = #tpu.core_type<tc>, window_params = [{transform_indices = @transform_0, window_bounds = array<i64: 1, 4, 256>}, {pipeline_mode = #tpu.pipeline_mode<synchronous>, transform_indices = @transform_1, window_bounds = array<i64: 4, 4>}, {pipeline_mode = #tpu.pipeline_mode<synchronous>, transform_indices = @transform_2, window_bounds = array<i64: 4, 1>}, {transform_indices = @transform_3, window_bounds = array<i64: 1, 4, 256>}]} {
    %c0 = arith.constant 0 : index
    %c0_0 = arith.constant 0 : index
    %c0_1 = arith.constant 0 : index
    %0 = vector.load %arg1[%c0, %c0_0, %c0_1] : memref<1x4x256xf32, #tpu.memory_space<vmem>>, vector<1x4x256xf32>
    %1 = vector.shape_cast %0 : vector<1x4x256xf32> to vector<4x256xf32>
    %cst = arith.constant dense<0.000000e+00> : vector<4xf32>
    %2 = vector.multi_reduction <add>, %1, %cst [1] : vector<4x256xf32> to vector<4xf32>
    %3 = vector.shape_cast %2 : vector<4xf32> to vector<4x1xf32>
    %c0_2 = arith.constant 0 : index
    %c0_3 = arith.constant 0 : index
    %4 = vector.load %arg2[%c0_2, %c0_3] : memref<4x4xf32, #tpu.memory_space<vmem>>, vector<4x4xf32>
    %cst_4 = arith.constant dense<0.000000e+00> : vector<4x1xf32>
    %5 = tpu.matmul %4, %3, %cst_4 {dimension_numbers = #tpu.dot_dimension_numbers<[1], [0], [0], [1], [0, 0, 1, 1], [], []>} : vector<4x4xf32>, vector<4x1xf32>, vector<4x1xf32> -> vector<4x1xf32>
    %c0_5 = arith.constant 0 : index
    %c0_6 = arith.constant 0 : index
    %6 = vector.load %arg3[%c0_5, %c0_6] : memref<4x1xf32, #tpu.memory_space<vmem>>, vector<4x1xf32>
    %7 = arith.addf %5, %6 : vector<4x1xf32>
    %cst_7 = arith.constant 0.000000e+00 : f32
    %cst_8 = arith.constant 1.000000e+00 : f32
    %8 = vector.broadcast %cst_7 : f32 to vector<4x1xf32>
    %9 = arith.maximumf %8, %7 : vector<4x1xf32>
    %10 = vector.broadcast %cst_8 : f32 to vector<4x1xf32>
    %11 = arith.minimumf %10, %9 : vector<4x1xf32>
    %12 = vector.broadcast %11 : vector<4x1xf32> to vector<4x256xf32>
    %13 = arith.mulf %1, %12 : vector<4x256xf32>
    %c0_9 = arith.constant 0 : index
    %c0_10 = arith.constant 0 : index
    %c0_11 = arith.constant 0 : index
    %14 = vector.load %arg4[%c0_9, %c0_10, %c0_11] : memref<1x4x256xf32, #tpu.memory_space<vmem>>, vector<1x4x256xf32>
    %15 = vector.shape_cast %14 : vector<1x4x256xf32> to vector<4x256xf32>
    %16 = vector.shape_cast %13 : vector<4x256xf32> to vector<1x4x256xf32>
    tpu.vector_store %arg4[%c0_9, %c0_10, %c0_11], %16 {strides = array<i32>} : memref<1x4x256xf32, #tpu.memory_space<vmem>>, vector<1x4x256xf32>,
    return
  }
  func.func @transform_0(%arg0: i32) -> (i32, i32, i32) {
    %c0_i32 = arith.constant 0 : i32
    %c0_i32_0 = arith.constant 0 : i32
    %c0_i32_1 = arith.constant 0 : i32
    return %arg0, %c0_i32, %c0_i32_0 : i32, i32, i32
  }
  func.func @transform_1(%arg0: i32) -> (i32, i32) {
    %c0_i32 = arith.constant 0 : i32
    %c0_i32_0 = arith.constant 0 : i32
    %c0_i32_1 = arith.constant 0 : i32
    return %c0_i32, %c0_i32_0 : i32, i32
  }
  func.func @transform_2(%arg0: i32) -> (i32, i32) {
    %c0_i32 = arith.constant 0 : i32
    %c0_i32_0 = arith.constant 0 : i32
    %c0_i32_1 = arith.constant 0 : i32
    return %c0_i32, %c0_i32_0 : i32, i32
  }
  func.func @transform_3(%arg0: i32) -> (i32, i32, i32) {
    %c0_i32 = arith.constant 0 : i32
    %c0_i32_0 = arith.constant 0 : i32
    %c0_i32_1 = arith.constant 0 : i32
    return %arg0, %c0_i32, %c0_i32_0 : i32, i32, i32
  }
}

</mosaic_0001>

<bundles_post_ra>
// kernel: tpu_custom_call.1
= control target key start
LH: loop header
LB: loop body
LE: loop exit
PB: predicated region body
PF: predicated region fallthrough
CT: control target
= control target key end

     0   :  { %8 = vsyncpa [#allocation3], 0  ;;  %s655_s0 = inlined_call_operand.hbm [shape: f32[2,4,256], index: 0, kind: input, shape index: {}]   ;;  %s656_s1 = inlined_call_operand.vmem [shape: f32[4,4], index: 1, kind: input, shape index: {}]   ;;  %s657_s2 = inlined_call_operand.vmem [shape: f32[4,1], index: 2, kind: input, shape index: {}]   ;;  %s658_s3 = inlined_call_operand.hbm [shape: f32[2,4,256], index: 3, kind: output, shape index: {}]  }
   0x1   :  { %10 = vsyncpa [#allocation3 + $0x1], 0 }
   0x2   :  { %11 = vsyncpa [#allocation4], 0 }
   0x3   :  { %13 = vsyncpa [#allocation4 + $0x1], 0  ;;  %s518_s12 = smov 0   ;;  %s520_s13 = smov 0  }
   0x4   :  { %s522_s14 = smov 0   ;;  %s524_s15 = smov 0  }
   0x5 LB: > { %s539_s16 = sadd.s32 4294967295, %s494_s15   ;;  %s331_s17 = sadd.s32 4294967294, %s494_s15   ;;  %s494_s15 = sphi %s524_s15, %s668_s15   ;;  %s490_s14 = sphi %s522_s14, %s667_s14   ;;  %s486_s13 = sphi %s520_s13, %s666_s13   ;;  %s482_s12 = sphi %s518_s12, %s665_s12  }
   0x6   : > { %s543_s18 = sadd.s32 1, %s494_s15   ;;  %s26_s19 = sadd.s32 1, %s490_s14 }
   0x7   : > { %s23_s20 = ssub.s32 %s494_s15, %s543_s18  ;;  %p33_p0 = scmp.ne.s32.totalorder %s490_s14, %s486_s13 }
   0x8   : > { %p24_p1 = scmp.eq.s32.totalorder %s23_s20, 0  ;;  %p34_p2 = scmp.eq.s32.totalorder %s494_s15, 0 }
   0x9   : > { %p39_p3 = scmp.ne.s32.totalorder %s486_s13, %s482_s12  ;;  %p40_p4 = scmp.eq.s32.totalorder %s539_s16, 0 }
   0xa   : > { %s555_s21 = scalar_select %p24_p1, %s490_s14, %s26_s19  }
   0xb   : > { %p557_p5 = por %p34_p2, %p33_p0  ;;  %p561_p6 = por %p40_p4, %p39_p3 }
   0xc   : > { %p105_p7 = scmp.eq.s32.totalorder %s539_s16, 1  ;;  %p111_p8 = scmp.eq.s32.totalorder %s331_s17, 1 }
   0xd   : > { %p361_p10 = scmp.lt.s32.totalorder %s494_s15, 2  ;;  %s137_s26 = sand.u32 1, %s490_s14  }
   0xe   : > { %p568_p11 = por %p105_p7, %p33_p0  ;;  %p572_p12 = por %p111_p8, %p39_p3 }
   0xf   : > { %s347_s27 = sshll.u32 %s494_s15, 3  ;;  %s334_s28 = sshll.u32 %s137_s26, 3 }
  0x10   : > { %s146_s4 = scalar_lea.hbm %s655_s0, %s347_s27  ;;  %s141_s6 = scalar_lea.vmem [#allocation2], %s334_s28 }
  0x11   : > { %s148_s5 = sshll.u32 %s146_s4, 4  ;;  %s150_s7 = sshll.u32 %s141_s6, 4  ;;  %s149_s5 = int_to_ptr.hbm [resolvable:$true] %s148_s5  ;;  %s151_s7 = int_to_ptr.vmem [resolvable:$true] %s150_s7 }
  0x12   : > { %p583_p13 = pnand %p361_p10, %p557_p5  ;;  %p337_p0 = scmp.ge.s32.totalorder %s494_s15, 1 }
  0x13   : > { %p155_p1 = scmp.lt.s32.totalorder %s494_s15, 3  ;;  %s138_s9 = scalar_lea.sflag [#allocation3], %s137_s26 }
  0x14   : > { %s398_s10 = sshra.s32 %s149_s5, 4  ;;  %p402_p3 = pneg %p583_p13  ;;  %s399_s10 = int_to_ptr.hbm [resolvable:$true] %s398_s10 }
  0x15   : > { %s400_s11 = scalar_lea.hbm %s399_s10, 8  ;;  %s405_s20 = scalar_lea.hbm %s655_s0, 16 }
  0x16   : > { %p401_p2 = scmp.ne.s32.totalorder %s399_s10, %s400_s11  ;;  %p406_p5 = scmp.lt.s32.totalorder %s399_s10, %s655_s0 }
  0x17   : > { %p407_p8 = scmp.lt.s32.totalorder %s405_s20, %s400_s11 }
  0x18   : > { %p403_p4 = pnand %p402_p3, %p401_p2 }
  0x19   : > { %p408_p10 = por %p407_p8, %p406_p5 }
  0x1a   : > { %p404_p7 = pneg %p403_p4 }
  0x1c   : > { %p409_p9 = pnand %p408_p10, %p404_p7 }
  0x1e   : > { %412 = shalt.err (!%p409_p9)
}
  0x1f   : > { %356 = dma.hbm_to_vmem [thread:$0]  (!%p583_p13), %s149_s5, 128, %s151_s7, %s138_s9  }
  0x20   : > { %p156_p2 = pnand %p337_p0, %p155_p1 }
  0x21   : > { %s604_s26 = sand.u32 (!%p156_p2), 1, %s486_s13  }
  0x22   : > { %159 = sbr.rel (%p156_p2) target bundleno = 423 (0x1a7), region = 32  ;;  %s338_s28 = sshll.u32 (!%p156_p2), %s604_s26, 3 }
  0x23   : > { %s162_s29 = scalar_lea.sflag (!%p156_p2), [#allocation3], %s604_s26  ;;  %s165_s30 = scalar_lea.vmem (!%p156_p2), [#allocation2], %s338_s28 }
  0x27   : > { %473 = dma.done.wait (%p561_p6), %s162_s29, 128  }
  0x28   : > { %475 = vsyncadd (%p561_p6), %s162_s29, 4294967168  ;;  %v189_v0 = vld [vmem:[%s165_s30] sm:$0xff]  ;;  %vm196_vm0 = vcmask 1043456   ;;  %v202_v6 = vld [vmem:[%s656_s1] sm:$0xf]  ;;  %vm204_vm1 = vcmask 31744  }
  0x29   : > { %191 = vst [vmem:[#allocation1] ss:$2 sm:$0xff] %v189_v0  ;;  %v496_v8 = vmov 0   ;;  %v203_v9 = vld [vmem:[%s657_s2] sm:$0xf]  ;;  %s348_s7 = sshll.u32 %s539_s16, 3 }
  0x2a   : > { %397 = vset.pattern.permute.xlu0 %v496_v8  ;;  %v497_v14 = vmov 839922192   ;;  %s256_s10 = scalar_lea.hbm %s658_s3, %s348_s7  ;;  %s188_s11 = scalar_lea.vmem [#allocation5], %s338_s28 }
  0x2b   : > { %v238_v15 = vunpack.c.l.s4 %v497_v14  ;;  %s258_s17 = sshll.u32 %s188_s11, 4  ;;  %s260_s19 = sshll.u32 %s256_s10, 4  ;;  %s259_s17 = int_to_ptr.vmem [resolvable:$true] %s258_s17  ;;  %s261_s19 = int_to_ptr.hbm [resolvable:$true] %s260_s19 }
  0x2c   : > { %s245_s20 = scalar_lea.sflag [#allocation4], %s604_s26  ;;  %s442_s22 = sshra.s32 %s261_s19, 4  ;;  %s443_s22 = int_to_ptr.hbm [resolvable:$true] %s442_s22 }
  0x2d   : > { %v239_v16 = vunpack.c.0.s8 %v238_v15  ;;  %s444_s16 = scalar_lea.hbm %s443_s22, 8  ;;  %s448_s30 = scalar_lea.hbm %s658_s3, 16 }
  0x2e   : > { %p445_p6 = scmp.ne.s32.totalorder %s443_s22, %s444_s16  ;;  %p449_p0 = scmp.lt.s32.totalorder %s443_s22, %s658_s3 }
  0x2f   : > { %p450_p1 = scmp.lt.s32.totalorder %s448_s30, %s444_s16 }
  0x30   : > { %v192_v1 = vld.sshfl [vmem:[#allocation1] sm:$0xff pattern:$0x75316420]  ;;  %v193_v2 = vld.sshfl [vmem:[#allocation1 + $0x8] sm:$0xff pattern:$0x75316420]  ;;  %p446_p9 = pnand %p445_p6, %p568_p11 }
  0x31   : > { %v197_v3 = vsel %vm196_vm0, %v192_v1, 0.0  ;;  %v198_v4 = vsel %vm196_vm0, %v193_v2, 0.0  ;;  %p451_p3 = por %p450_p1, %p449_p0 }
  0x32   : > { %v199_v5 = vadd.f32 %v198_v4, %v197_v3  ;;  %p447_p13 = pneg %p446_p9 }
  0x34   : > { %200 = vadd.xlane.f32.xlu0 %v199_v5  ;;  %p452_p4 = pnand %p451_p3, %p447_p13 }
  0xa7   : > { %v201_v7 = vpop.xlane.xlu0 %200 }
  0xa8   : > { %340 = vmatpush.msk.msra.mxu0 %vm196_vm0, %v201_v7 }
  0xa9   : > { %341 = vmatmul.msk.f32.vlgmr.msra.gmra.mxu0 %vm204_vm1, %v202_v6 }
 0x126   : > { %v228_v10 = vpop.f32.mrf.mxu0 }
 0x127   : > { %v229_v11 = vadd.f32 %v228_v10, %v203_v9 }
 0x129   : > { %v231_v12 = vmax.f32 %v229_v11, 0.0 }
 0x12b   : > { %v232_v13 = vmin.f32 %v231_v12, 1.0 }
 0x12d   : > { %235 = vperm.xlu0 %397, %v232_v13  }
 0x19f   : > { %v236_v17 = vpop.permute.xlu0 %235 }
 0x1a0   : > { %v240_v18 = vperm.slane %v236_v17, %v239_v16 }
 0x1a2   : > { %v242_v19 = vmul.f32 %v240_v18, %v189_v0 }
 0x1a4   : > { %243 = vst [vmem:[%s188_s11] sm:$0xff] %v242_v19 }
 0x1a5   : > { %455 = shalt.err (!%p452_p4)
}
 0x1a6   : > { %351 = dma.vmem_to_hbm [thread:$0]  (%p568_p11), %s259_s17, 128, %s261_s19, %s245_s20  }
 0x1a7 PF: > { %s272_s26 = sand.u32 1, %s482_s12   ;;  %p664_p7 = scmp.ge.s32.totalorder %s494_s15, 2 }
 0x1a8   : > { %s273_s5 = scalar_lea.sflag [#allocation4], %s272_s26 }
 0x1a9   : > { %p358_p5 = pnand %p664_p7, %p572_p12 }
 0x1ab   : > { %p359_p8 = pneg %p358_p5 }
 0x1ad   : > { %477 = dma.done.wait (%p359_p8), %s273_s5, 128  }
 0x1ae   : > { %479 = vsyncadd (%p359_p8), %s273_s5, 4294967168  ;;  %p16_p10 = scmp.ge.s32.totalorder %s543_s18, 4   ;;  %s665_s12 = smov %s486_s13 }
 0x1af   : > { %s666_s13 = smov %s490_s14  ;;  %s667_s14 = smov %s555_s21 }
 0x1b0   : > { %s668_s15 = smov %s543_s18  ;;  %18 = sbr.rel (!%p16_p10) target bundleno = 5 (0x5), region = 77 }
 0x1b5   :  { %279 = vsyncpa [#allocation3], 1 }
 0x1b6   :  { %281 = vsyncpa [#allocation3 + $0x1], 1 }
 0x1b7   :  { %282 = vsyncpa [#allocation4], 1 }
 0x1b8   :  { %284 = vsyncpa [#allocation4 + $0x1], 1 }

</bundles_post_ra>
